<compile_context>
chip_gen: v7x
topology: tpu7x:2x2x1
jax: 0.10.0
libtpu: 0.0.40
codegen_flags: <defaults>
</compile_context>

<pallas_src>
import functools

import jax
import jax.numpy as jnp
from jax import lax
from jax.experimental import pallas as pl
from jax.experimental.pallas import tpu as pltpu

_MASK_FILL = -1000000000.0  # matches torch masked_fill value in the module


# --------------------------------------------------------------------------- #
# Kernel                                                                       #
# --------------------------------------------------------------------------- #
def _sdpa_kernel(*refs, inv_temperature, has_mask, emit_attn, matmul_dtype):
    """One (batch b, q-tile i) grid step.

    refs = (q, k, v, [mask], out, [attn]) with block shapes
      q: (TQ, Dp)    k, v: (L, Dp)    mask: (TQ, L) or (1, L)
      out: (TQ, Dp)  attn: (TQ, L)
    """
    q_ref, k_ref, v_ref = refs[0], refs[1], refs[2]
    idx = 3
    mask_ref = None
    if has_mask:
        mask_ref = refs[idx]
        idx += 1
    out_ref = refs[idx]
    attn_ref = refs[idx + 1] if emit_attn else None

    mm_dtype = matmul_dtype if matmul_dtype is not None else v_ref.dtype

    # Scale the smaller (TQ, Dp) tensor, then cast matmul operands (no-op
    # unless matmul_dtype is set).
    q = (q_ref[...] * inv_temperature).astype(mm_dtype)
    k = k_ref[...].astype(mm_dtype)

    # s = (q / temperature) @ k^T as an NT contraction (no k transpose in
    # VMEM); f32 accumulation on the MXU.
    s = lax.dot_general(
        q, k,
        dimension_numbers=(((1,), (1,)), ((), ())),
        preferred_element_type=jnp.float32,
    )

    if has_mask:
        # attn.masked_fill(mask == 0, -1e9); mask consumed in caller's dtype.
        s = jnp.where(mask_ref[...] != 0, s, jnp.float32(_MASK_FILL))

    # TODO(synk): SparseAttention submodule (self.sa) source is not provided;
    # its reshape -> sa -> reshape -> (*1.0) step is applied as identity here.

    # Numerically-stable softmax over the key axis, kept in f32.
    m = jnp.max(s, axis=-1, keepdims=True)
    e = jnp.exp(s - m)
    denom = jnp.sum(e, axis=-1, keepdims=True)
    # EUP approximate reciprocal (separate issue slot) + one Newton step on the
    # tiny (TQ, 1) tensor -> exact to f32 rounding; attn rows sum to ~1.
    r = pl.reciprocal(denom, approx=True)
    r = r * (2.0 - denom * r)
    p = e * r

    if emit_attn:
        attn_ref[...] = p.astype(attn_ref.dtype)

    # output = attn @ v on the MXU, f32 accumulate.
    out_ref[...] = jnp.dot(
        p.astype(mm_dtype), v_ref[...].astype(mm_dtype),
        preferred_element_type=jnp.float32,
    ).astype(out_ref.dtype)


# --------------------------------------------------------------------------- #
# Tile-size / VMEM planning                                                    #
# --------------------------------------------------------------------------- #
def _vmem_budget_bytes():
    """Generation-aware VMEM budget: ~75% of physical VMEM (48 MiB on v7x's
    64 MiB, 96 MiB on v5e/v6e's 128 MiB), leaving headroom for compiler
    scratch, semaphores and spills."""
    cap = 64 << 20  # conservative fallback = smallest physical VMEM (v7x)
    try:
        info = pltpu.get_tpu_info()
        cap = int(getattr(info, "vmem_capacity_bytes", cap))
    except Exception:
        pass
    return (cap * 3) // 4


def _tq_cap():
    """Max q-tile rows: 256 on v5e (single vector-store slot, no bf16 VPU),
    else 512 -- measured sweeps show ~512-wide tiles already hit ~85% of the
    HBM roofline; bigger tiles only buy spill of the (TQ, L) intermediates."""
    try:
        kind = jax.devices()[0].device_kind.lower()
        if "v5 lite" in kind or "v5e" in kind or "v5litepod" in kind:
            return 256
    except Exception:
        pass
    return 512


def _working_set_bytes(L, Dp, TQ, *, qkv_bytes, attn_bytes, mask_bytes,
                       emit_attn, has_mask):
    """Double-buffered VMEM working set for one grid step, INCLUDING the
    in-kernel f32 softmax intermediates not covered by any BlockSpec buffer."""
    est = 0
    est += 2 * TQ * Dp * qkv_bytes          # q tile
    est += 2 * 2 * L * Dp * qkv_bytes       # k + v (whole-L per batch, 2-buf)
    est += 2 * TQ * Dp * qkv_bytes          # out tile
    if emit_attn:
        est += 2 * TQ * L * attn_bytes      # attn tile
    if has_mask:
        est += 2 * TQ * L * mask_bytes      # mask tile (caller's dtype)
    est += 3 * TQ * L * 4                   # s / e / p f32 intermediates
    return est


def _pick_tq(L, Dp, *, budget_bytes, tq_cap, **ws_kw):
    """Largest q-tile (multiple of 8 dividing L, or L itself) under budget."""
    cap = min(L, tq_cap)
    candidates = [t for t in (512, 256, 128, 64, 32, 16, 8)
                  if t <= cap and L % t == 0]
    if L <= tq_cap and L not in candidates:
        candidates.insert(0, L)
    if not candidates:
        candidates = [L]
    for tq in candidates:
        if _working_set_bytes(L, Dp, tq, **ws_kw) <= budget_bytes:
            return tq
    # TODO(synk): for very long L even the smallest q tile with whole-L K/V
    # exceeds the budget; a flash-style K-tiled online-softmax variant (with
    # single-buffered K/V) is the shape-robust path there.
    return candidates[-1]


# --------------------------------------------------------------------------- #
# Wrapper                                                                      #
# --------------------------------------------------------------------------- #
def scaled_dot_product_attention(q, k, v, temperature, mask=None, *,
                                 return_attn=True, attn_dtype=None,
                                 matmul_dtype=None, pad_head_dim=True):
    """q, k, v: (B, L, D); mask: (B, L, L) or (B, 1, L) in any dtype, or None.

    Returns (output, attn) like the torch module when return_attn=True, else
    just output.  attn_dtype defaults to the input dtype (torch semantics);
    pass jnp.bfloat16 to halve the dominant (B, L, L) attn HBM stream, or
    return_attn=False to remove it.  matmul_dtype=jnp.bfloat16 runs the two
    MXU matmuls in bf16 while the softmax stays in f32.
    """
    B, L, D = q.shape
    has_mask = mask is not None
    emit_attn = bool(return_attn)
    out_dtype = q.dtype
    attn_dtype = jnp.dtype(attn_dtype) if attn_dtype is not None else q.dtype

    # Lane-dense head dim: pad D to a multiple of 128 so q/k/v/out blocks use
    # full vreg rows and unmasked stores; zeros do not change QK^T or attn@V.
    Dp = D
    if pad_head_dim and D % 128 != 0:
        Dp = ((D + 127) // 128) * 128
        pad = ((0, 0), (0, 0), (0, Dp - D))
        q = jnp.pad(q, pad)
        k = jnp.pad(k, pad)
        v = jnp.pad(v, pad)

    budget = _vmem_budget_bytes()
    ws_kw = dict(
        qkv_bytes=q.dtype.itemsize,
        attn_bytes=attn_dtype.itemsize if emit_attn else 0,
        mask_bytes=mask.dtype.itemsize if has_mask else 0,
        emit_attn=emit_attn,
        has_mask=has_mask,
    )
    TQ = _pick_tq(L, Dp, budget_bytes=budget, tq_cap=_tq_cap(), **ws_kw)
    n_q = pl.cdiv(L, TQ)

    # v7x megacore: a (1, 1) grid (B == 1, single q tile) would leave one of
    # the two TensorCores idle -> split the q axis in two.
    if B == 1 and n_q == 1 and L >= 16 and L % 16 == 0:
        TQ = L // 2
        n_q = 2

    grid = (B, n_q)

    in_specs = [
        pl.BlockSpec((None, TQ, Dp), lambda b, i: (b, i, 0)),   # q tile
        pl.BlockSpec((None, L, Dp), lambda b, i: (b, 0, 0)),    # k (whole L)
        pl.BlockSpec((None, L, Dp), lambda b, i: (b, 0, 0)),    # v (whole L)
    ]
    args = [q, k, v]
    if has_mask:
        args.append(mask)   # consumed in the caller's dtype (no conversion op)
        if mask.shape[1] == 1:
            in_specs.append(pl.BlockSpec((None, 1, L), lambda b, i: (b, 0, 0)))
        else:
            in_specs.append(pl.BlockSpec((None, TQ, L), lambda b, i: (b, i, 0)))

    out_shape = [jax.ShapeDtypeStruct((B, L, Dp), out_dtype)]
    out_specs = [pl.BlockSpec((None, TQ, Dp), lambda b, i: (b, i, 0))]
    if emit_attn:
        out_shape.append(jax.ShapeDtypeStruct((B, L, L), attn_dtype))
        out_specs.append(pl.BlockSpec((None, TQ, L), lambda b, i: (b, i, 0)))

    est = _working_set_bytes(L, Dp, TQ, **ws_kw)
    # Generation-aware scoped-VMEM request: workload-scaled, floored well
    # above v5e's 16 MiB default and capped at ~75% of physical VMEM.
    vmem_limit = int(min(budget, max(est * 5 // 4 + (8 << 20), 32 << 20)))

    kernel = functools.partial(
        _sdpa_kernel,
        inv_temperature=float(1.0 / float(temperature)),
        has_mask=has_mask,
        emit_attn=emit_attn,
        matmul_dtype=matmul_dtype,
    )

    results = pl.pallas_call(
        kernel,
        out_shape=tuple(out_shape),
        grid_spec=pltpu.PrefetchScalarGridSpec(
            num_scalar_prefetch=0,
            grid=grid,
            in_specs=in_specs,
            out_specs=tuple(out_specs),
        ),
        compiler_params=pltpu.CompilerParams(
            # Both axes independent -> shard across v7x's two TensorCores.
            dimension_semantics=("parallel", "parallel"),
            vmem_limit_bytes=vmem_limit,
        ),
    )(*args)

    if emit_attn:
        out, attn = results
    else:
        out = results[0] if isinstance(results, (tuple, list)) else results
        attn = None
    if Dp != D:
        out = out[:, :, :D]
    return (out, attn) if emit_attn else out


# --------------------------------------------------------------------------- #
# Reference + test                                                             #
# --------------------------------------------------------------------------- #
def _reference(q, k, v, temperature, mask=None):
    attn = jnp.matmul(q / temperature, jnp.transpose(k, (0, 2, 1)))
    if mask is not None:
        attn = jnp.where(mask == 0, _MASK_FILL, attn)
    attn = jax.nn.softmax(attn, axis=-1)
    out = jnp.matmul(attn, v)
    return out, attn


if __name__ == "__main__":
    B, L, D = 2, 8, 32
    temperature = float(D) ** 0.5

    key = jax.random.PRNGKey(0)
    kq, kk, kv = jax.random.split(key, 3)
    q = jax.random.normal(kq, (B, L, D), dtype=jnp.float32)
    k = jax.random.normal(kk, (B, L, D), dtype=jnp.float32)
    v = jax.random.normal(kv, (B, L, D), dtype=jnp.float32)

    # Deterministic causal mask (exercises the masked_fill path), passed in
    # the caller's dtype (f32) with no wrapper-side conversion.
    mask = jnp.tril(jnp.ones((L, L), dtype=jnp.float32))[None, :, :].repeat(B, axis=0)

    ref_out, ref_attn = _reference(q, k, v, temperature, mask)
    ref_out_nm, _ = _reference(q, k, v, temperature, None)

    # 1) Masked path, default (exact) settings: (out, attn) in input dtype.
    out, attn = scaled_dot_product_attention(q, k, v, temperature, mask)
    out, attn = jax.block_until_ready((out, attn))
    assert jnp.allclose(out, ref_out, atol=2e-3, rtol=2e-3)
    assert jnp.allclose(attn, ref_attn, atol=2e-3, rtol=2e-3)

    # 2) No-mask path with return_attn=False (removes the (B, L, L) writeback).
    out_nm = scaled_dot_product_attention(q, k, v, temperature, None,
                                          return_attn=False)
    out_nm = jax.block_until_ready(out_nm)
    assert jnp.allclose(out_nm, ref_out_nm, atol=2e-3, rtol=2e-3)

    # 3) Masked path in perf mode: bf16 MXU matmuls + bf16 attn writeback.
    out_bf, attn_bf = scaled_dot_product_attention(
        q, k, v, temperature, mask,
        matmul_dtype=jnp.bfloat16, attn_dtype=jnp.bfloat16)
    out_bf, attn_bf = jax.block_until_ready((out_bf, attn_bf))
    assert jnp.allclose(out_bf.astype(jnp.float32), ref_out, atol=5e-2, rtol=5e-2)
    assert jnp.allclose(attn_bf.astype(jnp.float32), ref_attn, atol=5e-2, rtol=5e-2)

    print("KERNEL_OK")
</pallas_src>

<mosaic_0001>
module attributes {stable_mosaic.version = 11 : i64} {
  func.func @_sdpa_kernel(%arg0: i32, %arg1: i32, %arg2: memref<1x8x128xf32, #tpu.memory_space<vmem>>, %arg3: memref<1x8x128xf32, #tpu.memory_space<vmem>>, %arg4: memref<1x8x128xf32, #tpu.memory_space<vmem>>, %arg5: memref<1x8x8xf32, #tpu.memory_space<vmem>>, %arg6: memref<1x8x128xf32, #tpu.memory_space<vmem>>, %arg7: memref<1x8x8xf32, #tpu.memory_space<vmem>>) attributes {dimension_semantics = [#tpu.dimension_semantics<parallel>, #tpu.dimension_semantics<parallel>], iteration_bounds = array<i64: 2, 1>, scalar_prefetch = 0 : i64, scratch_operands = 0 : i64, tpu.core_type = #tpu.core_type<tc>, window_params = [{transform_indices = @transform_0, window_bounds = array<i64: 1, 8, 128>}, {transform_indices = @transform_1, window_bounds = array<i64: 1, 8, 128>}, {transform_indices = @transform_2, window_bounds = array<i64: 1, 8, 128>}, {transform_indices = @transform_3, window_bounds = array<i64: 1, 8, 8>}, {transform_indices = @transform_4, window_bounds = array<i64: 1, 8, 128>}, {transform_indices = @transform_5, window_bounds = array<i64: 1, 8, 8>}]} {
    %c0 = arith.constant 0 : index
    %c0_0 = arith.constant 0 : index
    %c0_1 = arith.constant 0 : index
    %0 = vector.load %arg2[%c0, %c0_0, %c0_1] : memref<1x8x128xf32, #tpu.memory_space<vmem>>, vector<1x8x128xf32>
    %1 = vector.shape_cast %0 : vector<1x8x128xf32> to vector<8x128xf32>
    %cst = arith.constant 0.176776692 : f32
    %2 = vector.broadcast %cst : f32 to vector<8x128xf32>
    %3 = arith.mulf %1, %2 : vector<8x128xf32>
    %c0_2 = arith.constant 0 : index
    %c0_3 = arith.constant 0 : index
    %c0_4 = arith.constant 0 : index
    %4 = vector.load %arg3[%c0_2, %c0_3, %c0_4] : memref<1x8x128xf32, #tpu.memory_space<vmem>>, vector<1x8x128xf32>
    %5 = vector.shape_cast %4 : vector<1x8x128xf32> to vector<8x128xf32>
    %cst_5 = arith.constant dense<0.000000e+00> : vector<8x8xf32>
    %6 = tpu.matmul %3, %5, %cst_5 {dimension_numbers = #tpu.dot_dimension_numbers<[1], [1], [0], [0], [0, 0, 1, 0], [], []>} : vector<8x128xf32>, vector<8x128xf32>, vector<8x8xf32> -> vector<8x8xf32>
    %c0_6 = arith.constant 0 : index
    %c0_7 = arith.constant 0 : index
    %c0_8 = arith.constant 0 : index
    %7 = vector.load %arg5[%c0_6, %c0_7, %c0_8] : memref<1x8x8xf32, #tpu.memory_space<vmem>>, vector<1x8x8xf32>
    %8 = vector.shape_cast %7 : vector<1x8x8xf32> to vector<8x8xf32>
    %cst_9 = arith.constant 0.000000e+00 : f32
    %9 = vector.broadcast %cst_9 : f32 to vector<8x8xf32>
    %10 = arith.cmpf one, %8, %9 : vector<8x8xf32>
    %cst_10 = arith.constant -1.000000e+09 : f32
    %11 = vector.broadcast %cst_10 : f32 to vector<8x8xf32>
    %12 = arith.select %10, %6, %11 : vector<8x8xi1>, vector<8x8xf32>
    %cst_11 = arith.constant dense<0xFF800000> : vector<8xf32>
    %13 = vector.multi_reduction <maximumf>, %12, %cst_11 [1] : vector<8x8xf32> to vector<8xf32>
    %14 = vector.shape_cast %13 : vector<8xf32> to vector<8x1xf32>
    %15 = vector.broadcast %14 : vector<8x1xf32> to vector<8x8xf32>
    %16 = arith.subf %12, %15 : vector<8x8xf32>
    %17 = math.exp %16 : vector<8x8xf32>
    %cst_12 = arith.constant dense<0.000000e+00> : vector<8xf32>
    %18 = vector.multi_reduction <add>, %17, %cst_12 [1] : vector<8x8xf32> to vector<8xf32>
    %19 = vector.shape_cast %18 : vector<8xf32> to vector<8x1xf32>
    %20 = tpu.reciprocal %19 {approx = true} : vector<8x1xf32> -> vector<8x1xf32>
    %21 = arith.mulf %19, %20 : vector<8x1xf32>
    %cst_13 = arith.constant 2.000000e+00 : f32
    %22 = vector.broadcast %cst_13 : f32 to vector<8x1xf32>
    %23 = arith.subf %22, %21 : vector<8x1xf32>
    %24 = arith.mulf %20, %23 : vector<8x1xf32>
    %25 = vector.broadcast %24 : vector<8x1xf32> to vector<8x8xf32>
    %26 = arith.mulf %17, %25 : vector<8x8xf32>
    %c0_14 = arith.constant 0 : index
    %c0_15 = arith.constant 0 : index
    %c0_16 = arith.constant 0 : index
    %27 = vector.load %arg7[%c0_14, %c0_15, %c0_16] : memref<1x8x8xf32, #tpu.memory_space<vmem>>, vector<1x8x8xf32>
    %28 = vector.shape_cast %27 : vector<1x8x8xf32> to vector<8x8xf32>
    %29 = vector.shape_cast %26 : vector<8x8xf32> to vector<1x8x8xf32>
    tpu.vector_store %arg7[%c0_14, %c0_15, %c0_16], %29 {strides = array<i32>} : memref<1x8x8xf32, #tpu.memory_space<vmem>>, vector<1x8x8xf32>,
    %c0_17 = arith.constant 0 : index
    %c0_18 = arith.constant 0 : index
    %c0_19 = arith.constant 0 : index
    %30 = vector.load %arg4[%c0_17, %c0_18, %c0_19] : memref<1x8x128xf32, #tpu.memory_space<vmem>>, vector<1x8x128xf32>
    %31 = vector.shape_cast %30 : vector<1x8x128xf32> to vector<8x128xf32>
    %cst_20 = arith.constant dense<0.000000e+00> : vector<8x128xf32>
    %32 = tpu.matmul %26, %31, %cst_20 {dimension_numbers = #tpu.dot_dimension_numbers<[1], [0], [0], [1], [0, 0, 1, 1], [], []>} : vector<8x8xf32>, vector<8x128xf32>, vector<8x128xf32> -> vector<8x128xf32>
    %c0_21 = arith.constant 0 : index
    %c0_22 = arith.constant 0 : index
    %c0_23 = arith.constant 0 : index
    %33 = vector.load %arg6[%c0_21, %c0_22, %c0_23] : memref<1x8x128xf32, #tpu.memory_space<vmem>>, vector<1x8x128xf32>
    %34 = vector.shape_cast %33 : vector<1x8x128xf32> to vector<8x128xf32>
    %35 = vector.shape_cast %32 : vector<8x128xf32> to vector<1x8x128xf32>
    tpu.vector_store %arg6[%c0_21, %c0_22, %c0_23], %35 {strides = array<i32>} : memref<1x8x128xf32, #tpu.memory_space<vmem>>, vector<1x8x128xf32>,
    return
  }
  func.func @transform_0(%arg0: i32, %arg1: i32) -> (i32, i32, i32) {
    %c0_i32 = arith.constant 0 : i32
    %c0_i32_0 = arith.constant 0 : i32
    return %arg0, %arg1, %c0_i32 : i32, i32, i32
  }
  func.func @transform_1(%arg0: i32, %arg1: i32) -> (i32, i32, i32) {
    %c0_i32 = arith.constant 0 : i32
    %c0_i32_0 = arith.constant 0 : i32
    %c0_i32_1 = arith.constant 0 : i32
    return %arg0, %c0_i32, %c0_i32_0 : i32, i32, i32
  }
  func.func @transform_2(%arg0: i32, %arg1: i32) -> (i32, i32, i32) {
    %c0_i32 = arith.constant 0 : i32
    %c0_i32_0 = arith.constant 0 : i32
    %c0_i32_1 = arith.constant 0 : i32
    return %arg0, %c0_i32, %c0_i32_0 : i32, i32, i32
  }
  func.func @transform_3(%arg0: i32, %arg1: i32) -> (i32, i32, i32) {
    %c0_i32 = arith.constant 0 : i32
    %c0_i32_0 = arith.constant 0 : i32
    return %arg0, %arg1, %c0_i32 : i32, i32, i32
  }
  func.func @transform_4(%arg0: i32, %arg1: i32) -> (i32, i32, i32) {
    %c0_i32 = arith.constant 0 : i32
    %c0_i32_0 = arith.constant 0 : i32
    return %arg0, %arg1, %c0_i32 : i32, i32, i32
  }
  func.func @transform_5(%arg0: i32, %arg1: i32) -> (i32, i32, i32) {
    %c0_i32 = arith.constant 0 : i32
    %c0_i32_0 = arith.constant 0 : i32
    return %arg0, %arg1, %c0_i32 : i32, i32, i32
  }
}

</mosaic_0001>

<bundles_post_ra>
// kernel: tpu_custom_call.1
= control target key start
LH: loop header
LB: loop body
LE: loop exit
PB: predicated region body
PF: predicated region fallthrough
CT: control target
= control target key end

     0   :  { %s1501_s0 = inlined_call_operand.hbm [shape: f32[2,8,128], index: 0, kind: input, shape index: {}]   ;;  %s1502_s1 = inlined_call_operand.hbm [shape: f32[2,8,128], index: 1, kind: input, shape index: {}]   ;;  %s1503_s2 = inlined_call_operand.hbm [shape: f32[2,8,128], index: 2, kind: input, shape index: {}]   ;;  %s1504_s3 = inlined_call_operand.hbm [shape: f32[2,8,8], index: 3, kind: input, shape index: {}]   ;;  %s1505_s4 = inlined_call_operand.hbm [shape: f32[2,8,128], index: 4, kind: output, shape index: {0}]   ;;  %s1506_s5 = inlined_call_operand.hbm [shape: f32[2,8,8], index: 5, kind: output, shape index: {1}]  }
   0x1   :  { %1517 = sst [smem:[#allocation24_spill]] %s1502_s1 }
   0x2   :  { %11 = vsyncpa [#allocation3], 0 }
   0x3   :  { %13 = vsyncpa [#allocation3 + $0x1], 0 }
   0x4   :  { %14 = vsyncpa [#allocation6], 0 }
   0x5   :  { %16 = vsyncpa [#allocation6 + $0x1], 0 }
   0x6   :  { %17 = vsyncpa [#allocation9], 0 }
   0x7   :  { %19 = vsyncpa [#allocation9 + $0x1], 0 }
   0x8   :  { %20 = vsyncpa [#allocation4], 0 }
   0x9   :  { %22 = vsyncpa [#allocation4 + $0x1], 0 }
   0xa   :  { %23 = vsyncpa [#allocation12], 0 }
   0xb   :  { %25 = vsyncpa [#allocation12 + $0x1], 0  ;;  %s1172_s18 = smov 0   ;;  %s1174_s19 = smov 0  }
   0xc   :  { %s1176_s20 = smov 0   ;;  %s1178_s21 = smov 0  }
   0xd   :  { %s1180_s22 = smov 0   ;;  %s1182_s23 = smov 0  }
   0xe LB: > { %1518 = sst [smem:[#allocation18_spill]] %s1120_s20  ;;  %s1203_s24 = sadd.s32 4294967295, %s1132_s23   ;;  %s1132_s23 = sphi %s1182_s23, %s31_s23   ;;  %s1128_s22 = sphi %s1180_s22, %s1546_s22   ;;  %s1124_s21 = sphi %s1178_s21, %s1545_s21   ;;  %s1120_s20 = sphi %s1176_s20, %s1544_s20   ;;  %s1116_s19 = sphi %s1174_s19, %s1548_s19   ;;  %s1112_s18 = sphi %s1172_s18, %s1547_s18  }
   0xf   : > { %1519 = sst [smem:[#allocation19_spill]] %s1128_s22  ;;  %s763_s25 = sadd.s32 4294967294, %s1132_s23  }
  0x10   : > { %1520 = sst [smem:[#allocation20_spill]] %s1132_s23  ;;  %s43_s26 = sadd.s32 1, %s1128_s22 }
  0x11   : > { %s52_s27 = sadd.s32 1, %s1120_s20  ;;  %p45_p0 = scmp.ge.s32.totalorder %s43_s26, 2 }
  0x12   : > { %p59_p1 = scmp.ne.s32.totalorder %s1120_s20, %s1116_s19  ;;  %p60_p2 = scmp.eq.s32.totalorder %s1132_s23, 0 }
  0x13   : > { %p65_p3 = scmp.ne.s32.totalorder %s1116_s19, %s1112_s18  ;;  %s1550_s26 = smov (%p45_p0, %s43_s26), 0 }
  0x14   : > { %1521 = sst [smem:[#allocation21_spill]] %s1550_s26  ;;  %p1215_p4 = por %p60_p2, %p59_p1 }
  0x15   : > { %p66_p5 = scmp.eq.s32.totalorder %s1203_s24, 0  ;;  %s47_s29 = ssub.s32 %s1128_s22, %s1550_s26 }
  0x16   : > { %p171_p6 = scmp.eq.s32.totalorder %s1203_s24, 1  ;;  %p50_p7 = scmp.eq.s32.totalorder %s47_s29, 0 }
  0x17   : > { %p1223_p8 = por %p66_p5, %p65_p3  ;;  %p177_p10 = scmp.eq.s32.totalorder %s763_s25, 1 }
  0x18   : > { %p1227_p9 = por %p171_p6, %p59_p1  ;;  %p834_p13 = scmp.lt.s32.totalorder %s1132_s23, 2 }
  0x19   : > { %s1523_s30 = scalar_select %p1223_p8, 1, 0 }
  0x1a   : > { %s1524_s6 = scalar_select %p1227_p9, 1, 0 }
  0x1b   : > { %s1232_s7 = scalar_select %p50_p7, %s1120_s20, %s52_s27  }
  0x1c   : > { %p1234_p11 = por %p177_p10, %p65_p3  ;;  %s1241_s9 = sand.u32 1, %s1120_s20  }
  0x1d   : > { %1525 = sst [smem:[#allocation22_spill]] %s1232_s7  ;;  %s1244_s10 = sshll.u32 %s1241_s9, 3 }
  0x1e   : > { %s1526_s8 = scalar_select %p1234_p11, 1, 0 }
  0x1f   : > { %s1247_s11 = sshll.u32 %s1128_s22, 7  ;;  %p1251_p0 = pnand %p834_p13, %p1215_p4 }
  0x20   : > { %1527 = sst [smem:[#allocation23_spill]] %s1526_s8  ;;  %s244_s13 = sand.u32 1, %s1132_s23  }
  0x21   : > { %s1528_s12 = scalar_select %p1251_p0, 1, 0 }
  0x22   : > { %s1529_s1 = sld [smem:[#allocation24_spill]]  ;;  %s248_s17 = scalar_lea.vmem [#allocation5], %s1244_s10 }
  0x23   : > { %s255_s25 = sshll.u32 %s248_s17, 4  ;;  %s1267_s27 = scalar_lea.sflag [#allocation6], %s244_s13  ;;  %s1264_s25 = int_to_ptr.vmem [resolvable:$true] %s255_s25 }
  0x24   : > { %p1273_p4 = pneg %p1251_p0 }
  0x28   : > { %s1260_s16 = scalar_lea.hbm %s1529_s1, %s1247_s11  ;;  %s895_s17 = scalar_lea.hbm %s1529_s1, 256 }
  0x29   : > { %s890_s28 = scalar_lea.hbm %s1260_s16, 128  ;;  %p896_p7 = scmp.lt.u32.totalorder %s1260_s16, %s1529_s1 }
  0x2a   : > { %p891_p3 = scmp.ne.s32.totalorder %s1260_s16, %s890_s28  ;;  %p897_p10 = scmp.lt.u32.totalorder %s895_s17, %s890_s28 }
  0x2b   : > { %p899_p12 = scmp.lt.u32.totalorder %s890_s28, %s1260_s16 }
  0x2c   : > { %p893_p5 = pnand %p1273_p4, %p891_p3  ;;  %p898_p13 = por %p897_p10, %p896_p7 }
  0x2e   : > { %p894_p6 = pneg %p893_p5  ;;  %p900_p1 = por %p899_p12, %p898_p13 }
  0x30   : > { %p901_p2 = pnand %p900_p1, %p894_p6 }
  0x32   : > { %904 = shalt.err (!%p901_p2)
}
  0x33   : > { %s905_s13 = scalar_lea.vmem %s1264_s25, 128  ;;  %s1134_s14 = smov [#allocation5]  }
  0x34   : > { %p906_p3 = scmp.ne.s32.totalorder %s1264_s25, %s905_s13  ;;  %s910_s15 = sshll.u32 %s1134_s14, 4  ;;  %s911_s15 = int_to_ptr.vmem [resolvable:$false] %s910_s15 }
  0x35   : > { %s912_s22 = scalar_lea.vmem %s911_s15, 256  ;;  %p913_p9 = scmp.lt.s32.totalorder %s1264_s25, %s911_s15 }
  0x36   : > { %p908_p5 = pnand %p906_p3, %p1273_p4  ;;  %p914_p8 = scmp.lt.s32.totalorder %s912_s22, %s905_s13 }
  0x38   : > { %p909_p11 = pneg %p908_p5  ;;  %p915_p7 = por %p914_p8, %p913_p9 }
  0x3a   : > { %p916_p10 = pnand %p915_p7, %p909_p11 }
  0x3c   : > { %919 = shalt.err (!%p916_p10)
}
  0x3d   : > { %820 = dma.hbm_to_vmem [thread:$0]  (!%p1251_p0), %s1260_s16, 128, %s1264_s25, %s1267_s27  }
  0x3e   : > { %p1531_p12 = scmp.lt.s32.totalorder %s1132_s23, 3  ;;  %p1532_p1 = scmp.ge.s32.totalorder %s1132_s23, 1 }
  0x3f   : > { %s1309_s13 = scalar_lea.hbm %s1501_s0, %s1247_s11  ;;  %s229_s14 = scalar_lea.vmem [#allocation2], %s1244_s10 }
  0x40   : > { %p1301_p2 = pnand %p1532_p1, %p1531_p12  ;;  %s237_s15 = sshll.u32 %s229_s14, 4  ;;  %s1312_s15 = int_to_ptr.vmem [resolvable:$true] %s237_s15 }
  0x41   : > { %s1318_s22 = scalar_lea.hbm %s1503_s2, %s1247_s11  ;;  %s226_s1 = scalar_lea.sflag [#allocation3], %s1241_s9 }
  0x42   : > { %s1533_s26 = scalar_select %p1301_p2, 1, 0 }
  0x43   : > { %s920_s7 = scalar_lea.hbm %s1309_s13, 128  ;;  %s925_s20 = scalar_lea.hbm %s1501_s0, 256 }
  0x44   : > { %p921_p8 = scmp.ne.s32.totalorder %s1309_s13, %s920_s7  ;;  %p926_p6 = scmp.lt.u32.totalorder %s1309_s13, %s1501_s0 }
  0x45   : > { %p927_p13 = scmp.lt.u32.totalorder %s925_s20, %s920_s7  ;;  %p929_p5 = scmp.lt.u32.totalorder %s920_s7, %s1309_s13 }
  0x46   : > { %p923_p9 = pnand %p921_p8, %p1273_p4 }
  0x47   : > { %p928_p3 = por %p927_p13, %p926_p6 }
  0x48   : > { %p924_p11 = pneg %p923_p9 }
  0x49   : > { %p930_p7 = por %p929_p5, %p928_p3 }
  0x4b   : > { %p931_p10 = pnand %p930_p7, %p924_p11 }
  0x4d   : > { %934 = shalt.err (!%p931_p10)
}
  0x4e   : > { %s935_s14 = scalar_lea.vmem %s1312_s15, 128  ;;  %s1135_s16 = smov [#allocation2]  }
  0x4f   : > { %p936_p12 = scmp.ne.s32.totalorder %s1312_s15, %s935_s14  ;;  %s940_s25 = sshll.u32 %s1135_s16, 4  ;;  %s941_s25 = int_to_ptr.vmem [resolvable:$false] %s940_s25 }
  0x50   : > { %s942_s23 = scalar_lea.vmem %s941_s25, 256  ;;  %p943_p9 = scmp.lt.s32.totalorder %s1312_s15, %s941_s25 }
  0x51   : > { %p938_p1 = pnand %p936_p12, %p1273_p4  ;;  %p944_p2 = scmp.lt.s32.totalorder %s942_s23, %s935_s14 }
  0x53   : > { %p939_p8 = pneg %p938_p1  ;;  %p945_p6 = por %p944_p2, %p943_p9 }
  0x55   : > { %p946_p13 = pnand %p945_p6, %p939_p8 }
  0x57   : > { %949 = shalt.err (!%p946_p13)
}
  0x58   : > { %817 = dma.hbm_to_vmem [thread:$0]  (!%p1251_p0), %s1309_s13, 128, %s1312_s15, %s226_s1  }
  0x59   : > { %s266_s20 = scalar_lea.vmem [#allocation7], %s1244_s10  ;;  %s950_s8 = scalar_lea.hbm %s1318_s22, 128 }
  0x5a   : > { %s273_s7 = sshll.u32 %s266_s20, 4  ;;  %p951_p11 = scmp.ne.s32.totalorder %s1318_s22, %s950_s8  ;;  %s274_s7 = int_to_ptr.vmem [resolvable:$true] %s273_s7 }
  0x5b   : > { %s955_s14 = scalar_lea.hbm %s1503_s2, 256  ;;  %p956_p5 = scmp.lt.u32.totalorder %s1318_s22, %s1503_s2 }
  0x5c   : > { %p953_p2 = pnand %p951_p11, %p1273_p4  ;;  %p957_p7 = scmp.lt.u32.totalorder %s955_s14, %s950_s8 }
  0x5d   : > { %p959_p12 = scmp.lt.u32.totalorder %s950_s8, %s1318_s22 }
  0x5e   : > { %p954_p3 = pneg %p953_p2  ;;  %p958_p10 = por %p957_p7, %p956_p5 }
  0x60   : > { %p960_p1 = por %p959_p12, %p958_p10 }
  0x62   : > { %p961_p8 = pnand %p960_p1, %p954_p3 }
  0x64   : > { %964 = shalt.err (!%p961_p8)
}
  0x65   : > { %s965_s1 = scalar_lea.vmem %s274_s7, 128  ;;  %s1136_s13 = smov [#allocation7]  }
  0x66   : > { %p966_p9 = scmp.ne.s32.totalorder %s274_s7, %s965_s1  ;;  %s970_s15 = sshll.u32 %s1136_s13, 4  ;;  %s971_s15 = int_to_ptr.vmem [resolvable:$false] %s970_s15 }
  0x67   : > { %s972_s23 = scalar_lea.vmem %s971_s15, 256  ;;  %p973_p11 = scmp.lt.s32.totalorder %s274_s7, %s971_s15 }
  0x68   : > { %p968_p6 = pnand %p966_p9, %p1273_p4  ;;  %p974_p2 = scmp.lt.s32.totalorder %s972_s23, %s965_s1 }
  0x6a   : > { %p969_p13 = pneg %p968_p6  ;;  %p975_p0 = por %p974_p2, %p973_p11 }
  0x6c   : > { %p976_p5 = pnand %p975_p0, %p969_p13 }
  0x6e   : > { %979 = shalt.err (!%p976_p5)
}
  0x6f   : > { %p1534_p7 = scmp.ne.s32.totalorder %s1528_s12, 0  ;;  %s1365_s28 = scalar_lea.hbm %s1504_s3, %s1247_s11 }
  0x70   : > { %s284_s17 = scalar_lea.vmem [#allocation8], %s1244_s10  ;;  %s281_s16 = scalar_lea.sflag [#allocation9], %s1241_s9 }
  0x71   : > { %823 = dma.hbm_to_vmem [thread:$0]  (!%p1534_p7), %s1318_s22, 128, %s274_s7, %s1267_s27  }
  0x72   : > { %s292_s14 = sshll.u32 %s284_s17, 4  ;;  %s980_s25 = scalar_lea.hbm %s1365_s28, 128  ;;  %s293_s14 = int_to_ptr.vmem [resolvable:$true] %s292_s14 }
  0x73   : > { %p981_p0 = scmp.ne.s32.totalorder %s1365_s28, %s980_s25  ;;  %s985_s22 = scalar_lea.hbm %s1504_s3, 256 }
  0x74   : > { %p986_p12 = scmp.lt.u32.totalorder %s1365_s28, %s1504_s3  ;;  %p987_p1 = scmp.lt.u32.totalorder %s985_s22, %s980_s25 }
  0x75   : > { %p983_p3 = pnand %p981_p0, %p1273_p4  ;;  %p989_p9 = scmp.lt.u32.totalorder %s980_s25, %s1365_s28 }
  0x76   : > { %p988_p8 = por %p987_p1, %p986_p12 }
  0x77   : > { %p984_p10 = pneg %p983_p3 }
  0x78   : > { %p990_p6 = por %p989_p9, %p988_p8 }
  0x7a   : > { %p991_p13 = pnand %p990_p6, %p984_p10 }
  0x7c   : > { %994 = shalt.err (!%p991_p13)
}
  0x7d   : > { %s995_s9 = scalar_lea.vmem %s293_s14, 128  ;;  %s1137_s10 = smov [#allocation8]  }
  0x7e   : > { %p996_p11 = scmp.ne.s32.totalorder %s293_s14, %s995_s9  ;;  %s1000_s13 = sshll.u32 %s1137_s10, 4  ;;  %s1001_s13 = int_to_ptr.vmem [resolvable:$false] %s1000_s13 }
  0x7f   : > { %s1002_s15 = scalar_lea.vmem %s1001_s13, 256  ;;  %p1003_p0 = scmp.lt.s32.totalorder %s293_s14, %s1001_s13 }
  0x80   : > { %p998_p2 = pnand %p996_p11, %p1273_p4  ;;  %p1004_p3 = scmp.lt.s32.totalorder %s1002_s15, %s995_s9 }
  0x82   : > { %p999_p5 = pneg %p998_p2  ;;  %p1005_p7 = por %p1004_p3, %p1003_p0 }
  0x84   : > { %p1006_p1 = pnand %p1005_p7, %p999_p5 }
  0x86   : > { %1009 = shalt.err (!%p1006_p1)
}
  0x87   : > { %p1535_p12 = scmp.ne.s32.totalorder %s1528_s12, 0  ;;  %p1536_p10 = scmp.ne.s32.totalorder %s1533_s26, 0 }
  0x88   : > { %s1389_s29 = sand.u32 (!%p1536_p10), 1, %s1116_s19   ;;  %p1537_p4 = scmp.ne.s32.totalorder (!%p1536_p10), %s1523_s30, 0 }
  0x89   : > { %826 = dma.hbm_to_vmem [thread:$0]  (!%p1535_p12), %s1365_s28, 128, %s293_s14, %s281_s16  }
  0x8a   : > { %301 = sbr.rel (%p1536_p10) target bundleno = 917 (0x395), region = 36  ;;  %s1392_s23 = sshll.u32 (!%p1536_p10), %s1389_s29, 3 }
  0x8b   : > { %s304_s20 = scalar_lea.sflag (!%p1536_p10), [#allocation3], %s1389_s29  ;;  %s307_s8 = scalar_lea.vmem (!%p1536_p10), [#allocation2], %s1392_s23 }
  0x91   : > { %1091 = dma.done.wait (%p1537_p4), %s304_s20, 128  }
  0x92   : > { %1093 = vsyncadd (%p1537_p4), %s304_s20, 4294967168  ;;  %s312_s12 = sand.u32 1, %s1203_s24   ;;  %s316_s28 = scalar_lea.vmem [#allocation5], %s1392_s23 }
  0x93   : > { %s313_s26 = scalar_lea.sflag [#allocation6], %s312_s12 }
  0x94   : > { %1095 = dma.done.wait (%p1537_p4), %s313_s26, 256  }
  0x95   : > { %1097 = vsyncadd (%p1537_p4), %s313_s26, 4294967040  ;;  %s325_s17 = scalar_lea.vmem [#allocation7], %s1392_s23  ;;  %s331_s14 = scalar_lea.sflag [#allocation9], %s1389_s29 }
  0x96   : > { %s334_s16 = scalar_lea.vmem [#allocation8], %s1392_s23 }
  0x97   : > { %1099 = dma.done.wait (%p1537_p4), %s331_s14, 128  }
  0x98   : > { %1101 = vsyncadd (%p1537_p4), %s331_s14, 4294967168  ;;  %v1138_v0 = vmov 0.0   ;;  %vm1139_vm0 = vmmov 0   ;;  %v383_v1 = vld [vmem:[%s316_s28] sm:$0xff]  ;;  %v381_v2 = vld [vmem:[%s307_s8] sm:$0xff]  ;;  %vm457_vm2 = vcmask 64512  }
  0x99   : > { %792 = vmatprep.subr.mxu0 %v1138_v0  ;;  %794 = vmatprep.mubr.msk.f32.mxu0 %vm1139_vm0, %v1138_v0  ;;  %v382_v3 = vmul.f32 0.17677669, %v381_v2  ;;  %v454_v4 = vld [vmem:[%s334_s16] sm:$0xff]  ;;  %v473_v14 = vld [vmem:[%s325_s17] sm:$0xff]  ;;  %s380_s24 = scalar_lea.vmem [#allocation11], %s1392_s23  ;;  %s784_s30 = sshll.u32 %s1124_s21, 7 }
  0x9a   : > { %797 = vmatprep.subr.mxu1 %v1138_v0  ;;  %799 = vmatprep.mubr.msk.f32.mxu1 %vm1139_vm0, %v1138_v0  ;;  %vm455_vm1 = vcmp.ne.f32.partialorder %v454_v4, 0.0  ;;  %s1426_s27 = scalar_lea.hbm %s1506_s5, %s784_s30  ;;  %s582_s22 = sshll.u32 %s380_s24, 4  ;;  %s583_s22 = int_to_ptr.vmem [resolvable:$true] %s582_s22 }
  0x9b   : > { %793 = vmatpush3.xpose.msra.mxu0 %v383_v1  ;;  %798 = vmatpush3.msra.mxu1 %v473_v14  ;;  %s554_s7 = scalar_lea.sflag [#allocation12], %s1389_s29  ;;  %s1010_s11 = scalar_lea.vmem %s583_s22, 128 }
  0x9c   : > { %p1011_p7 = scmp.ne.s32.totalorder %s583_s22, %s1010_s11  ;;  %p1538_p8 = scmp.ne.s32.totalorder %s1524_s6, 0 }
  0x9d   : > { %s1140_s9 = smov [#allocation11]  }
  0x9e   : > { %795 = vmatmul.mubr.f32.vlgmr.msra.gmra.mrb[0].mxu0 %v382_v3  ;;  %p1012_p9 = pnand %p1011_p7, %p1538_p8  ;;  %s1014_s10 = sshll.u32 %s1140_s9, 4  ;;  %s1015_s10 = int_to_ptr.vmem [resolvable:$false] %s1014_s10 }
  0x9f   : > { %s1016_s13 = scalar_lea.vmem %s1015_s10, 256  ;;  %p1017_p13 = scmp.lt.s32.totalorder %s583_s22, %s1015_s10 }
  0xa0   : > { %p1013_p6 = pneg %p1012_p9  ;;  %p1018_p11 = scmp.lt.s32.totalorder %s1016_s13, %s1010_s11 }
  0xa2   : > { %p1019_p2 = por %p1018_p11, %p1017_p13 }
  0xa4   : > { %p1020_p5 = pnand %p1019_p2, %p1013_p6 }
 0x171   : > { %v450_v5 = vpop.f32.mrb[0].mxu0 }
 0x172   : > { %v456_v6 = vsel %vm455_vm1, %v450_v5, -1e+09  ;;  %v796_v7 = vpop.f32.mrb[1].mxu0 }
 0x173   : > { %v458_v8 = vsel %vm457_vm2, %v456_v6, -inf }
 0x174   : > { %459 = vmax.xlane.f32.xlu0 %v458_v8 }
 0x201   : > { %v460_v9 = vpop.xlane.xlu0 %459 }
 0x202   : > { %v461_v10 = vsub.f32 %v456_v6, %v460_v9 }
 0x204   : > { %v462_v11 = vmul.f32 1.442695, %v461_v10 }
 0x206   : > { %886 = vpow2.f32 %v462_v11 }
 0x210   : > { %v887_v12 = vpop.eup %886 }
 0x211   : > { %v464_v13 = vsel %vm457_vm2, %v887_v12, 0.0 }
 0x212   : > { %465 = vadd.xlane.f32.xlu0 %v464_v13 }
 0x29f   : > { %v466_v15 = vpop.xlane.xlu0 %465 }
 0x2a0   : > { %888 = vrcp.f32 %v466_v15 }
 0x2aa   : > { %v889_v16 = vpop.eup %888 }
 0x2ab   : > { %v468_v17 = vmul.f32 %v889_v16, %v466_v15 }
 0x2ad   : > { %v469_v18 = vsub.f32 2.0, %v468_v17 }
 0x2af   : > { %v470_v19 = vmul.f32 %v889_v16, %v469_v18 }
 0x2b1   : > { %v471_v20 = vmul.f32 %v887_v12, %v470_v19 }
 0x2b3   : > { %800 = vmatmul.mubr.msk.f32.vlgmr.msra.gmra.mrb[0].mxu1 %vm457_vm2, %v471_v20  ;;  %472 = vst.msk [vmem:[%s380_s24] sm:$0xff] %vm457_vm2, %v471_v20 }
 0x2b4   : > { %1023 = shalt.err (!%p1020_p5)
}
 0x2b5   : > { %s1024_s15 = scalar_lea.hbm %s1426_s27, 128  ;;  %s1028_s12 = scalar_lea.hbm %s1506_s5, 256 }
 0x2b6   : > { %p1025_p0 = scmp.ne.s32.totalorder %s1426_s27, %s1024_s15  ;;  %p1029_p12 = scmp.lt.u32.totalorder %s1426_s27, %s1506_s5 }
 0x2b7   : > { %p1030_p10 = scmp.lt.u32.totalorder %s1028_s12, %s1024_s15  ;;  %p1032_p7 = scmp.lt.u32.totalorder %s1024_s15, %s1426_s27 }
 0x2b8   : > { %p1026_p3 = pnand %p1025_p0, %p1538_p8 }
 0x2b9   : > { %p1031_p4 = por %p1030_p10, %p1029_p12 }
 0x2ba   : > { %p1027_p1 = pneg %p1026_p3 }
 0x2bb   : > { %p1033_p9 = por %p1032_p7, %p1031_p4 }
 0x2bd   : > { %p1034_p6 = pnand %p1033_p9, %p1027_p1 }
 0x2bf   : > { %1037 = shalt.err (!%p1034_p6)
}
 0x2c0   : > { %811 = dma.vmem_to_hbm [thread:$0]  (%p1538_p8), %s583_s22, 128, %s1426_s27, %s554_s7  }
 0x2c1   : > { %s373_s17 = scalar_lea.vmem [#allocation10], %s1392_s23  ;;  %s1454_s25 = scalar_lea.hbm %s1505_s4, %s784_s30 }
 0x2c2   : > { %s568_s14 = sshll.u32 %s373_s17, 4  ;;  %s549_s1 = scalar_lea.sflag [#allocation4], %s1389_s29  ;;  %s1447_s14 = int_to_ptr.vmem [resolvable:$true] %s568_s14 }
 0x2c3   : > { %s1038_s11 = scalar_lea.vmem %s1447_s14, 128  ;;  %s1141_s23 = smov [#allocation10]  }
 0x2c4   : > { %p1039_p13 = scmp.ne.s32.totalorder %s1447_s14, %s1038_s11  ;;  %s1042_s27 = sshll.u32 %s1141_s23, 4  ;;  %s1043_s27 = int_to_ptr.vmem [resolvable:$false] %s1042_s27 }
 0x2c5   : > { %s1044_s21 = scalar_lea.vmem %s1043_s27, 256  ;;  %p1045_p5 = scmp.lt.s32.totalorder %s1447_s14, %s1043_s27 }
 0x2c6   : > { %p1040_p11 = pnand %p1039_p13, %p1538_p8  ;;  %p1046_p0 = scmp.lt.s32.totalorder %s1044_s21, %s1038_s11 }
 0x2c8   : > { %p1041_p2 = pneg %p1040_p11  ;;  %p1047_p3 = por %p1046_p0, %p1045_p5 }
 0x2ca   : > { %p1048_p1 = pnand %p1047_p3, %p1041_p2 }
 0x386   : > { %v543_v21 = vpop.f32.mrb[0].mxu1 }
 0x387   : > { %547 = vst [vmem:[%s373_s17] sm:$0xff] %v543_v21  ;;  %v801_v22 = vpop.f32.mrb[1].mxu1 }
 0x388   : > { %1051 = shalt.err (!%p1048_p1)
}
 0x389   : > { %s1052_s29 = scalar_lea.hbm %s1454_s25, 128  ;;  %s1056_s7 = scalar_lea.hbm %s1505_s4, 256 }
 0x38a   : > { %p1053_p12 = scmp.ne.s32.totalorder %s1454_s25, %s1052_s29  ;;  %p1057_p7 = scmp.lt.u32.totalorder %s1454_s25, %s1505_s4 }
 0x38b   : > { %p1058_p9 = scmp.lt.u32.totalorder %s1056_s7, %s1052_s29  ;;  %p1060_p13 = scmp.lt.u32.totalorder %s1052_s29, %s1454_s25 }
 0x38c   : > { %p1054_p10 = pnand %p1053_p12, %p1538_p8 }
 0x38d   : > { %p1059_p6 = por %p1058_p9, %p1057_p7 }
 0x38e   : > { %p1055_p4 = pneg %p1054_p10 }
 0x38f   : > { %p1061_p11 = por %p1060_p13, %p1059_p6 }
 0x391   : > { %p1062_p2 = pnand %p1061_p11, %p1055_p4 }
 0x393   : > { %1065 = shalt.err (!%p1062_p2)
}
 0x394   : > { %810 = dma.vmem_to_hbm [thread:$0]  (%p1538_p8), %s1447_s14, 128, %s1454_s25, %s549_s1  }
 0x395 PF: > { %s1539_s13 = sld [smem:[#allocation23_spill]]  ;;  %s1540_s15 = sld [smem:[#allocation20_spill]] }
 0x396   : > { %s594_s20 = sand.u32 1, %s1112_s18  }
 0x397   : > { %s595_s8 = scalar_lea.sflag [#allocation4], %s594_s20 }
 0x39b   : > { %p1541_p5 = scmp.ne.s32.totalorder %s1539_s13, 0  ;;  %p1542_p0 = scmp.ge.s32.totalorder %s1540_s15, 2 }
 0x39d   : > { %p828_p3 = pnand %p1542_p0, %p1541_p5 }
 0x39f   : > { %1103 = dma.done.wait (!%p828_p3), %s595_s8, 128  }
 0x3a0   : > { %1105 = vsyncadd (!%p828_p3), %s595_s8, 4294967168  ;;  %s604_s12 = scalar_lea.sflag [#allocation12], %s594_s20 }
 0x3a1   : > { %1107 = dma.done.wait (!%p828_p3), %s604_s12, 128  }
 0x3a2   : > { %1109 = vsyncadd (!%p828_p3), %s604_s12, 4294967168  ;;  %s31_s23 = sadd.s32 1, %s1540_s15   ;;  %s1543_s6 = sld [smem:[#allocation18_spill]] }
 0x3a3   : > { %p28_p1 = scmp.ge.s32.totalorder %s31_s23, 4   ;;  %s1544_s20 = sld [smem:[#allocation22_spill]] }
 0x3a4   : > { %s1545_s21 = sld [smem:[#allocation19_spill]]  ;;  %s1546_s22 = sld [smem:[#allocation21_spill]] }
 0x3a5   : > { %s1547_s18 = smov %s1116_s19  ;;  %30 = sbr.rel (!%p28_p1) target bundleno = 14 (0xe), region = 135 }
 0x3a8   : > { %s1548_s19 = smov %s1543_s6 }
 0x3ac   :  { %609 = vsyncpa [#allocation3], 1 }
 0x3ad   :  { %611 = vsyncpa [#allocation3 + $0x1], 1 }
 0x3ae   :  { %612 = vsyncpa [#allocation6], 1 }
 0x3af   :  { %614 = vsyncpa [#allocation6 + $0x1], 1 }
 0x3b0   :  { %615 = vsyncpa [#allocation9], 1 }
 0x3b1   :  { %617 = vsyncpa [#allocation9 + $0x1], 1 }
 0x3b2   :  { %618 = vsyncpa [#allocation4], 1 }
 0x3b3   :  { %620 = vsyncpa [#allocation4 + $0x1], 1 }
 0x3b4   :  { %621 = vsyncpa [#allocation12], 1 }
 0x3b5   :  { %623 = vsyncpa [#allocation12 + $0x1], 1 }

</bundles_post_ra>
